<compile_context>
chip_gen: v7x
topology: tpu7x:2x2x1
jax: 0.10.0
libtpu: 0.0.40
codegen_flags: <defaults>
</compile_context>

<pallas_src>
import functools

import jax
import jax.numpy as jnp
from jax import lax
from jax.experimental import pallas as pl
from jax.experimental.pallas import tpu as pltpu


@functools.lru_cache(maxsize=1)
def _vmem_limit_bytes():
    """Generation-aware scoped-VMEM limit (~3/4 of capacity, capped at 100 MiB)."""
    cap = 128 * 1024 * 1024
    try:
        info = pltpu.get_tpu_info()
        cap = int(getattr(info, "vmem_capacity_bytes", cap))
    except Exception:  # pragma: no cover - non-TPU / interpret fallback
        pass
    return min((cap * 3) // 4, 100 * 1024 * 1024)


def _pick_tile(dim, targets):
    """Largest target tile that divides dim (>=, so exact sizes use the big tile);
    falls back to the full dim (compile-time VMEM risk only for odd huge shapes)."""
    for t in targets:
        if dim >= t and dim % t == 0:
            return t
    return dim


# ----------------------------------------------------------------------------
# Tiled linear:  y[M, Nout] = x[M, K] @ w[Nout, K]^T   (PyTorch Linear layout)
# Operands are pre-cast by the caller (bf16); f32 VMEM accumulator.
# ----------------------------------------------------------------------------
def _matmul_kernel(x_ref, w_ref, o_ref, acc_ref):
    @pl.when(pl.program_id(2) == 0)
    def _init():
        acc_ref[...] = jnp.zeros_like(acc_ref)

    # contract x's K axis with w's axis 1 ((out, in) layout) -> no transpose.
    acc_ref[...] += lax.dot_general(
        x_ref[...], w_ref[...],
        dimension_numbers=(((1,), (1,)), ((), ())),
        preferred_element_type=jnp.float32,
    )

    @pl.when(pl.program_id(2) == pl.num_programs(2) - 1)
    def _fin():
        o_ref[...] = acc_ref[...].astype(o_ref.dtype)


def _linear(x2d, w, out_dtype):
    """x2d: (M, K), w: (Nout, K) in PyTorch (out, in) layout -> (M, Nout)."""
    M, K = x2d.shape
    Nout, K2 = w.shape
    assert K == K2
    tm = _pick_tile(M, (512, 256, 128))
    tn = _pick_tile(Nout, (512, 256, 128))
    tk = _pick_tile(K, (1024, 512, 256, 128))
    grid = (M // tm, Nout // tn, K // tk)
    return pl.pallas_call(
        _matmul_kernel,
        out_shape=jax.ShapeDtypeStruct((M, Nout), out_dtype),
        grid_spec=pltpu.PrefetchScalarGridSpec(
            num_scalar_prefetch=0,
            grid=grid,
            in_specs=[
                pl.BlockSpec((tm, tk), lambda i, j, k: (i, k)),
                pl.BlockSpec((tn, tk), lambda i, j, k: (j, k)),
            ],
            out_specs=pl.BlockSpec((tm, tn), lambda i, j, k: (i, j)),
            scratch_shapes=[pltpu.VMEM((tm, tn), jnp.float32)],
        ),
        compiler_params=pltpu.CompilerParams(
            dimension_semantics=("parallel", "parallel", "arbitrary"),
            vmem_limit_bytes=_vmem_limit_bytes(),
        ),
    )(x2d, w)


# ----------------------------------------------------------------------------
# Pruning masks: tiny O(B*N*H*C) f32 pre-pass straight from x and w_qkv.
# mean is linear, so  mean_j attn[i, j] = scale * q_i . mean_j k_j, and the
# projections of the means collapse to per-head vectors u_row/u_col in x-space.
# (lax.top_k / one-hot scatter have no Pallas primitive -> plain JAX.)
# ----------------------------------------------------------------------------
def _prune_masks(x, w_qkv, heads, dim_head, height_top_k, width_top_k, scale):
    """Returns row_mask, col_mask, both (B, N, H) float32 (seq position major)."""
    B, N, C = x.shape
    hp = lax.Precision.HIGHEST
    wq = w_qkv[:C].reshape(heads, dim_head, C)
    wk = w_qkv[C:2 * C].reshape(heads, dim_head, C)

    x_mean = jnp.mean(x, axis=1)                                      # (B, C)
    k_mean = jnp.einsum("bc,hdc->bhd", x_mean, wk, precision=hp)      # (B, H, dh)
    q_mean = jnp.einsum("bc,hdc->bhd", x_mean, wq, precision=hp)      # (B, H, dh)
    u_row = jnp.einsum("bhd,hdc->bhc", k_mean, wq, precision=hp)      # (B, H, C)
    u_col = jnp.einsum("bhd,hdc->bhc", q_mean, wk, precision=hp)      # (B, H, C)
    row_scores = jnp.einsum("bnc,bhc->bhn", x, u_row, precision=hp) * scale
    col_scores = jnp.einsum("bnc,bhc->bhn", x, u_col, precision=hp) * scale

    _, top_row = lax.top_k(row_scores, height_top_k)
    _, top_col = lax.top_k(col_scores, width_top_k)
    row_mask = jnp.sum(jax.nn.one_hot(top_row, N, dtype=jnp.float32), axis=-2)
    col_mask = jnp.sum(jax.nn.one_hot(top_col, N, dtype=jnp.float32), axis=-2)

    # (B, N, H): the kernel reads a (tile, 1) column per head -> no transpose.
    return jnp.swapaxes(row_mask, 1, 2), jnp.swapaxes(col_mask, 1, 2)


# ----------------------------------------------------------------------------
# Fused pruned attention: one program per (batch, query-tile), heads inside.
# ----------------------------------------------------------------------------
def _fused_attn_kernel(q_ref, k_ref, v_ref, rmask_ref, cmask_ref, o_ref, *,
                       heads, dim_head, scale):
    # q_ref: (tq, C) bf16; k_ref/v_ref: (N, C) bf16 full slabs
    # rmask_ref: (tq, H) f32; cmask_ref: (N, H) f32; o_ref: (tq, C) bf16
    # NOTE: with dim_head=32 the MXU contraction is underfilled; the kernel is
    # VPU/EUP bound, so elementwise work is folded into the small operands.
    head_outs = []
    for h in range(heads):                        # static unroll, H is small
        lo = h * dim_head
        hi = lo + dim_head
        # Fold scale + row mask into q, col mask into k (0/1 masks => zeroed
        # operand => zero logit; identical to masking the logits, and the
        # masked logits still take part in softmax with value 0 like PyTorch).
        rscale = rmask_ref[:, h:h + 1] * scale                     # (tq, 1) f32
        qh = (q_ref[:, lo:hi] * rscale).astype(jnp.bfloat16)       # (tq, dh)
        kh = (k_ref[:, lo:hi] * cmask_ref[:, h:h + 1]).astype(jnp.bfloat16)
        vh = v_ref[:, lo:hi]                                       # (N, dh) bf16

        s = lax.dot_general(                                       # (tq, N) f32
            qh, kh, (((1,), (1,)), ((), ())),
            preferred_element_type=jnp.float32,
        )
        # softmax elementwise math stays f32 (v5e has no bf16 VPU/EUP).
        m = jnp.max(s, axis=1, keepdims=True)
        p = jnp.exp(s - m)
        denom = jnp.sum(p, axis=1, keepdims=True)                  # (tq, 1)

        oh = jnp.dot(p.astype(jnp.bfloat16), vh,
                     preferred_element_type=jnp.float32)           # (tq, dh)
        # deferred normalization on the small (tq, dh) output, not on (tq, N).
        oh = oh * pl.reciprocal(denom, approx=True)
        head_outs.append(oh.astype(o_ref.dtype))

    # single unmasked lane-dense (tq, C) store.
    o_ref[...] = jnp.concatenate(head_outs, axis=1)


def _kv_block_spec(N, C, chunk_index):
    index_map = lambda b, qi, _c=chunk_index: (b, 0, _c)
    try:
        # Single-buffer K/V: their block only changes with the batch index, so
        # one exposed DMA per batch and half the VMEM footprint (v7x budget).
        return pl.BlockSpec((None, N, C), index_map, pipeline_mode=pl.Buffered(1))
    except TypeError:  # older API without pipeline_mode -> default double-buffer
        return pl.BlockSpec((None, N, C), index_map)


def _attention(qkv, row_mask, col_mask, heads, dim_head, scale):
    """qkv: (B, N, 3C) bf16, masks (B, N, H) f32 -> (B, N, C) bf16."""
    B, N, C3 = qkv.shape
    C = heads * dim_head
    assert C3 == 3 * C
    tq = _pick_tile(N, (256, 128))
    grid = (B, N // tq)

    kernel = functools.partial(_fused_attn_kernel, heads=heads,
                               dim_head=dim_head, scale=scale)

    q_spec = pl.BlockSpec((None, tq, C), lambda b, qi: (b, qi, 0))
    k_spec = _kv_block_spec(N, C, 1)
    v_spec = _kv_block_spec(N, C, 2)
    rmask_spec = pl.BlockSpec((None, tq, heads), lambda b, qi: (b, qi, 0))
    cmask_spec = pl.BlockSpec((None, N, heads), lambda b, qi: (b, 0, 0))
    out_spec = pl.BlockSpec((None, tq, C), lambda b, qi: (b, qi, 0))

    # Bias the megacore split to the batch axis when possible so both cores do
    # not re-DMA the same full K/V slab (v7x has 2 TCs per chip).
    dims = ("parallel", "arbitrary") if B >= 2 else ("arbitrary", "parallel")

    return pl.pallas_call(
        kernel,
        out_shape=jax.ShapeDtypeStruct((B, N, C), jnp.bfloat16),
        grid=grid,
        in_specs=[q_spec, k_spec, v_spec, rmask_spec, cmask_spec],
        out_specs=out_spec,
        compiler_params=pltpu.CompilerParams(
            dimension_semantics=dims,
            vmem_limit_bytes=_vmem_limit_bytes(),
        ),
    )(qkv, qkv, qkv, row_mask, col_mask)


# ----------------------------------------------------------------------------
# Module forward
# ----------------------------------------------------------------------------
def dual_pruned_self_attn(x, w_qkv, w_out, heads, dim_head,
                          height_top_k, width_top_k):
    """x: (B, N, C) f32; w_qkv: (3C, C); w_out: (C, C)  (PyTorch Linear layout)."""
    B, N, C = x.shape
    assert C == heads * dim_head
    scale = dim_head ** (-0.5)

    # f32 pruning scores + top-k from the original inputs (tiny, stable).
    row_mask, col_mask = _prune_masks(x, w_qkv, heads, dim_head,
                                      height_top_k, width_top_k, scale)

    # One-time bf16 casts of activations / weights (all MXU paths are bf16).
    x_bf = x.astype(jnp.bfloat16)
    w_qkv_bf = w_qkv.astype(jnp.bfloat16)
    w_out_bf = w_out.astype(jnp.bfloat16)

    # to_qkv: bf16 operands, f32 accumulation, bf16 qkv in HBM.
    qkv = _linear(x_bf.reshape(B * N, C), w_qkv_bf,
                  out_dtype=jnp.bfloat16).reshape(B, N, 3 * C)

    # Fused pruned attention, lane-dense bf16 (B, N, C) output.
    attn_out = _attention(qkv, row_mask, col_mask, heads, dim_head, scale)

    # to_out: bf16 operands, f32 accumulation, final output in x's dtype.
    out = _linear(attn_out.reshape(B * N, C), w_out_bf,
                  out_dtype=x.dtype).reshape(B, N, C)
    return out


# ----------------------------------------------------------------------------
# Pure-JAX references (mirror the PyTorch forward), used only for self-test.
# ----------------------------------------------------------------------------
def _reference_masks(x, w_qkv, heads, dim_head, height_top_k, width_top_k):
    B, N, C = x.shape
    hp = lax.Precision.HIGHEST
    qkv = jnp.dot(x, jnp.transpose(w_qkv), precision=hp)
    q, k, _ = jnp.split(qkv, 3, axis=-1)

    def to_heads(t):
        return t.reshape(B, N, heads, dim_head).transpose(0, 2, 1, 3)

    q, k = to_heads(q), to_heads(k)
    attn = jnp.einsum("bhid,bhjd->bhij", q, k, precision=hp) * dim_head ** (-0.5)
    _, top_row = lax.top_k(attn.mean(axis=-1), height_top_k)
    _, top_col = lax.top_k(attn.mean(axis=-2), width_top_k)
    row_mask = jnp.sum(jax.nn.one_hot(top_row, N, dtype=jnp.float32), axis=-2)
    col_mask = jnp.sum(jax.nn.one_hot(top_col, N, dtype=jnp.float32), axis=-2)
    return row_mask, col_mask                                        # (B, H, N)


def _reference_attention(x, w_qkv, w_out, heads, dim_head, row_mask, col_mask):
    """Full-precision forward given precomputed (B, H, N) 0/1 masks."""
    B, N, C = x.shape
    hp = lax.Precision.HIGHEST
    qkv = jnp.dot(x, jnp.transpose(w_qkv), precision=hp)
    q, k, v = jnp.split(qkv, 3, axis=-1)

    def to_heads(t):
        return t.reshape(B, N, heads, dim_head).transpose(0, 2, 1, 3)

    q, k, v = map(to_heads, (q, k, v))
    attn = jnp.einsum("bhid,bhjd->bhij", q, k, precision=hp) * dim_head ** (-0.5)
    attn = attn * row_mask[..., :, None] * col_mask[..., None, :]
    attn = jax.nn.softmax(attn, axis=-1)
    out = jnp.einsum("bhij,bhjd->bhid", attn, v, precision=hp)
    out = out.transpose(0, 2, 1, 3).reshape(B, N, C)
    return jnp.dot(out, jnp.transpose(w_out), precision=hp)


# ----------------------------------------------------------------------------
if __name__ == "__main__":
    B, N = 2, 16
    heads, dim_head = 4, 32
    dim = heads * dim_head            # 128 (lane-dense channel dim)
    height_top_k, width_top_k = 5, 6  # must be <= N

    key = jax.random.PRNGKey(0)
    kx, kq, ko = jax.random.split(key, 3)
    x = jax.random.normal(kx, (B, N, dim), dtype=jnp.float32)
    # Deterministic synthetic weights (PyTorch Linear layout: (out, in)).
    w_qkv = jax.random.normal(kq, (3 * dim, dim), dtype=jnp.float32) * dim ** -0.5
    w_out = jax.random.normal(ko, (dim, dim), dtype=jnp.float32) * dim ** -0.5

    out = dual_pruned_self_attn(x, w_qkv, w_out, heads, dim_head,
                                height_top_k, width_top_k)
    out = jax.block_until_ready(out)
    assert out.shape == (B, N, dim)

    def rel_err(a, b):
        a = a.astype(jnp.float32)
        b = b.astype(jnp.float32)
        return float(jnp.linalg.norm(a - b) / (jnp.linalg.norm(b) + 1e-12))

    ref_row, ref_col = _reference_masks(x, w_qkv, heads, dim_head,
                                        height_top_k, width_top_k)
    ref = _reference_attention(x, w_qkv, w_out, heads, dim_head, ref_row, ref_col)
    err = rel_err(out, ref)
    TOL = 5e-2  # bf16 MXU operands + approx reciprocal vs f32 HIGHEST reference
    if err > TOL:
        # Near-tied pruning scores can legitimately pick different top-k indices
        # than the reference; re-check against a mask-consistent reference.
        k_row, k_col = _prune_masks(x, w_qkv, heads, dim_head,
                                    height_top_k, width_top_k, dim_head ** -0.5)
        ref2 = _reference_attention(x, w_qkv, w_out, heads, dim_head,
                                    jnp.swapaxes(k_row, 1, 2),
                                    jnp.swapaxes(k_col, 1, 2))
        err2 = rel_err(out, ref2)
        if err2 > TOL:
            raise AssertionError(
                f"mismatch vs reference: rel_l2={err:.3e}, "
                f"mask-consistent rel_l2={err2:.3e}")

    print("KERNEL_OK")
</pallas_src>

<mosaic_0001>
module attributes {stable_mosaic.version = 11 : i64} {
  func.func @_matmul_kernel(%arg0: i32, %arg1: i32, %arg2: i32, %arg3: memref<32x128xbf16, #tpu.memory_space<vmem>>, %arg4: memref<128x128xbf16, #tpu.memory_space<vmem>>, %arg5: memref<32x128xbf16, #tpu.memory_space<vmem>>, %arg6: memref<32x128xf32, #tpu.memory_space<vmem>>) attributes {dimension_semantics = [#tpu.dimension_semantics<parallel>, #tpu.dimension_semantics<parallel>, #tpu.dimension_semantics<arbitrary>], iteration_bounds = array<i64: 1, 3, 1>, scalar_prefetch = 0 : i64, scratch_operands = 1 : i64, tpu.core_type = #tpu.core_type<tc>, window_params = [{transform_indices = @transform_0, window_bounds = array<i64: 32, 128>}, {transform_indices = @transform_1, window_bounds = array<i64: 128, 128>}, {transform_indices = @transform_2, window_bounds = array<i64: 32, 128>}]} {
    %c0_i32 = arith.constant 0 : i32
    %0 = arith.cmpi eq, %arg2, %c0_i32 : i32
    %1 = arith.extui %0 : i1 to i32
    %c0_i32_0 = arith.constant 0 : i32
    %2 = arith.cmpi ne, %1, %c0_i32_0 : i32
    scf.if %2 {
      %cst_10 = arith.constant 0.000000e+00 : f32
      %12 = vector.broadcast %cst_10 : f32 to vector<32x128xf32>
      %c0_11 = arith.constant 0 : index
      %c0_12 = arith.constant 0 : index
      %13 = vector.load %arg6[%c0_11, %c0_12] : memref<32x128xf32, #tpu.memory_space<vmem>>, vector<32x128xf32>
      tpu.vector_store %arg6[%c0_11, %c0_12], %12 {strides = array<i32>} : memref<32x128xf32, #tpu.memory_space<vmem>>, vector<32x128xf32>,
    } else {
    }
    %c0 = arith.constant 0 : index
    %c0_1 = arith.constant 0 : index
    %3 = vector.load %arg6[%c0, %c0_1] : memref<32x128xf32, #tpu.memory_space<vmem>>, vector<32x128xf32>
    %c0_2 = arith.constant 0 : index
    %c0_3 = arith.constant 0 : index
    %4 = vector.load %arg3[%c0_2, %c0_3] : memref<32x128xbf16, #tpu.memory_space<vmem>>, vector<32x128xbf16>
    %c0_4 = arith.constant 0 : index
    %c0_5 = arith.constant 0 : index
    %5 = vector.load %arg4[%c0_4, %c0_5] : memref<128x128xbf16, #tpu.memory_space<vmem>>, vector<128x128xbf16>
    %cst = arith.constant dense<0.000000e+00> : vector<32x128xf32>
    %6 = tpu.matmul %4, %5, %cst {dimension_numbers = #tpu.dot_dimension_numbers<[1], [1], [0], [0], [0, 0, 1, 0], [], []>} : vector<32x128xbf16>, vector<128x128xbf16>, vector<32x128xf32> -> vector<32x128xf32>
    %7 = arith.addf %3, %6 : vector<32x128xf32>
    %c0_6 = arith.constant 0 : index
    %c0_7 = arith.constant 0 : index
    %8 = vector.load %arg6[%c0_6, %c0_7] : memref<32x128xf32, #tpu.memory_space<vmem>>, vector<32x128xf32>
    tpu.vector_store %arg6[%c0_6, %c0_7], %7 {strides = array<i32>} : memref<32x128xf32, #tpu.memory_space<vmem>>, vector<32x128xf32>,
    %c0_i32_8 = arith.constant 0 : i32
    %9 = arith.cmpi eq, %arg2, %c0_i32_8 : i32
    %10 = arith.extui %9 : i1 to i32
    %c0_i32_9 = arith.constant 0 : i32
    %11 = arith.cmpi ne, %10, %c0_i32_9 : i32
    scf.if %11 {
      %c0_10 = arith.constant 0 : index
      %c0_11 = arith.constant 0 : index
      %12 = vector.load %arg6[%c0_10, %c0_11] : memref<32x128xf32, #tpu.memory_space<vmem>>, vector<32x128xf32>
      %13 = arith.truncf %12 : vector<32x128xf32> to vector<32x128xbf16>
      %c0_12 = arith.constant 0 : index
      %c0_13 = arith.constant 0 : index
      %14 = vector.load %arg5[%c0_12, %c0_13] : memref<32x128xbf16, #tpu.memory_space<vmem>>, vector<32x128xbf16>
      tpu.vector_store %arg5[%c0_12, %c0_13], %13 {strides = array<i32>} : memref<32x128xbf16, #tpu.memory_space<vmem>>, vector<32x128xbf16>,
    } else {
    }
    return
  }
  func.func @transform_0(%arg0: i32, %arg1: i32, %arg2: i32) -> (i32, i32) {
    %c0_i32 = arith.constant 0 : i32
    return %arg0, %arg2 : i32, i32
  }
  func.func @transform_1(%arg0: i32, %arg1: i32, %arg2: i32) -> (i32, i32) {
    %c0_i32 = arith.constant 0 : i32
    return %arg1, %arg2 : i32, i32
  }
  func.func @transform_2(%arg0: i32, %arg1: i32, %arg2: i32) -> (i32, i32) {
    %c0_i32 = arith.constant 0 : i32
    return %arg0, %arg1 : i32, i32
  }
}

</mosaic_0001>

<bundles_post_ra>
// kernel: tpu_custom_call.1
= control target key start
LH: loop header
LB: loop body
LE: loop exit
PB: predicated region body
PF: predicated region fallthrough
CT: control target
= control target key end

     0   :  { %7 = vsyncpa [#allocation4], 0  ;;  %s1069_s0 = inlined_call_operand.hbm [shape: bf16[32,128], index: 0, kind: input, shape index: {}]   ;;  %s1070_s1 = inlined_call_operand.hbm [shape: bf16[384,128], index: 1, kind: input, shape index: {}]   ;;  %s1071_s2 = inlined_call_operand.hbm [shape: bf16[32,384], index: 2, kind: output, shape index: {}]  }
   0x1   :  { %8 = vsyncpa [#allocation7], 0 }
   0x2   :  { %10 = vsyncpa [#allocation7 + $0x1], 0 }
   0x3   :  { %11 = vsyncpa [#allocation5], 0 }
   0x4   :  { %13 = vsyncpa [#allocation5 + $0x1], 0  ;;  %s845_s9 = smov 0   ;;  %s847_s10 = smov 0  }
   0x5   :  { %s849_s11 = smov 0   ;;  %s851_s12 = smov 0  }
   0x6   :  { %s853_s13 = smov 0   ;;  %s855_s14 = smov 0  }
   0x7 LB: > { %s512_s15 = sadd.s32 4294967295, %s820_s14   ;;  %s513_s16 = sadd.s32 4294967294, %s820_s14   ;;  %s820_s14 = sphi %s855_s14, %s19_s14   ;;  %s816_s13 = sphi %s853_s13, %s1094_s13   ;;  %s812_s12 = sphi %s851_s12, %s1093_s12   ;;  %s808_s11 = sphi %s849_s11, %s1092_s11   ;;  %s804_s10 = sphi %s847_s10, %s1091_s10   ;;  %s800_s9 = sphi %s845_s9, %s1090_s9  }
   0x8   : > { %p88_p0 = scmp.ne.s32.totalorder %s804_s10, %s800_s9  ;;  %p879_p1 = scmp.eq.s32.totalorder %s512_s15, 0 }
   0x9   : > { %p883_p2 = scmp.eq.s32.totalorder %s512_s15, 2  ;;  %p120_p3 = scmp.eq.s32.totalorder %s513_s16, 2 }
   0xa   : > { %s1076_s17 = scalar_select %p879_p1, 1, 0 }
   0xb   : > { %s1077_s18 = scalar_select %p883_p2, 1, 0 }
   0xc   : > { %p889_p4 = por %p879_p1, %p88_p0  ;;  %p514_p5 = scmp.ge.s32.totalorder %s820_s14, 1 }
   0xd   : > { %p894_p6 = por %p120_p3, %p88_p0  ;;  %p127_p7 = scmp.lt.s32.totalorder %s820_s14, 4 }
   0xe   : > { %s1078_s19 = scalar_select %p889_p4, 1, 0 }
   0xf   : > { %s1079_s20 = scalar_select %p894_p6, 1, 0 }
  0x10   : > { %p899_p8 = pnand %p514_p5, %p127_p7  ;;  %s822_s22 = smov [#allocation3]  }
  0x11   : > { %s143_s23 = sshll.u32 %s822_s22, 4  ;;  %s34_s25 = sadd.s32 1, %s816_s13  ;;  %s144_s23 = int_to_ptr.vmem [resolvable:$true] %s143_s23 }
  0x12   : > { %s1080_s21 = scalar_select %p899_p8, 1, 0 }
  0x13   : > { %p596_p9 = pneg %p899_p8  ;;  %s676_s28 = scalar_lea.hbm %s1069_s0, 256 }
  0x14   : > { %p677_p11 = scmp.ne.s32.totalorder %s1069_s0, %s676_s28  ;;  %p683_p3 = scmp.lt.u32.totalorder %s676_s28, %s1069_s0 }
  0x15   : > { %p907_p10 = pnand %p596_p9, %p879_p1 }
  0x17   : > { %p678_p12 = pneg %p907_p10 }
  0x19   : > { %p679_p13 = pnand %p678_p12, %p677_p11 }
  0x1b   : > { %p680_p0 = pneg %p679_p13 }
  0x1d   : > { %p685_p5 = pnand %p683_p3, %p680_p0 }
  0x1f   : > { %688 = shalt.err (!%p685_p5)
}
  0x20   : > { %s689_s5 = scalar_lea.vmem %s144_s23, 256  ;;  %p697_p4 = scmp.lt.s32.totalorder %s144_s23, %s144_s23 }
  0x21   : > { %p690_p7 = scmp.ne.s32.totalorder %s144_s23, %s689_s5  ;;  %p698_p1 = scmp.lt.s32.totalorder %s689_s5, %s689_s5 }
  0x23   : > { %p692_p9 = pnand %p690_p7, %p678_p12  ;;  %p699_p8 = por %p698_p1, %p697_p4 }
  0x25   : > { %p693_p6 = pneg %p692_p9 }
  0x27   : > { %p700_p2 = pnand %p699_p8, %p693_p6 }
  0x29   : > { %703 = shalt.err (!%p700_p2)
}
  0x2a   : > { %s823_s6 = smov 64   ;;  %s824_s7 = smov 4  }
  0x2b   : > { %599 = dma.hbm_to_vmem [thread:$0]  (!%p907_p10), %s1069_s0, 256, %s144_s23, [#allocation4], %s823_s6, %s823_s6, %s824_s7  }
  0x2c   : > { %p36_p1 = scmp.ge.s32.totalorder %s34_s25, 3  ;;  %s75_s16 = sadd.s32 1, %s808_s11 }
  0x2d   : > { %p82_p2 = scmp.ne.s32.totalorder %s808_s11, %s804_s10  ;;  %p83_p4 = scmp.eq.s32.totalorder %s820_s14, 0 }
  0x2e   : > { %s1096_s25 = smov (%p36_p1, %s34_s25), 0  ;;  %p1083_p8 = scmp.ne.s32.totalorder %s1077_s18, 0 }
  0x2f   : > { %p937_p6 = por %p83_p4, %p82_p2  ;;  %s70_s26 = ssub.s32 %s816_s13, %s1096_s25 }
  0x30   : > { %p943_p11 = por %p1083_p8, %p82_p2  ;;  %p609_p12 = scmp.lt.s32.totalorder %s820_s14, 3 }
  0x31   : > { %p73_p10 = scmp.eq.s32.totalorder %s70_s26, 0  ;;  %s157_s23 = sand.u32 1, %s808_s11  }
  0x32   : > { %s517_s27 = sshll.u32 %s157_s23, 6  ;;  %s542_s29 = sshll.u32 %s816_s13, 10 }
  0x33   : > { %s952_s28 = scalar_select %p73_p10, %s808_s11, %s75_s16  }
  0x34   : > { %s958_s4 = scalar_lea.hbm %s1070_s1, %s542_s29  ;;  %s161_s18 = scalar_lea.vmem [#allocation6], %s517_s27 }
  0x35   : > { %s169_s5 = sshll.u32 %s161_s18, 4  ;;  %p964_p13 = pnand %p609_p12, %p937_p6  ;;  %s960_s5 = int_to_ptr.vmem [resolvable:$true] %s169_s5 }
  0x36   : > { %s968_s15 = scalar_lea.sflag [#allocation7], %s157_s23  ;;  %s704_s16 = scalar_lea.hbm %s958_s4, 1024 }
  0x37   : > { %p705_p0 = scmp.ne.s32.totalorder %s958_s4, %s704_s16  ;;  %p706_p3 = pneg %p964_p13 }
  0x38   : > { %s709_s22 = scalar_lea.hbm %s1070_s1, 3072  ;;  %p710_p9 = scmp.lt.u32.totalorder %s958_s4, %s1070_s1 }
  0x39   : > { %p707_p5 = pnand %p706_p3, %p705_p0  ;;  %p711_p1 = scmp.lt.u32.totalorder %s709_s22, %s704_s16 }
  0x3a   : > { %p713_p4 = scmp.lt.u32.totalorder %s704_s16, %s958_s4 }
  0x3b   : > { %p708_p7 = pneg %p707_p5  ;;  %p712_p2 = por %p711_p1, %p710_p9 }
  0x3d   : > { %p714_p6 = por %p713_p4, %p712_p2 }
  0x3f   : > { %p715_p8 = pnand %p714_p6, %p708_p7 }
  0x41   : > { %718 = shalt.err (!%p715_p8)
}
  0x42   : > { %s719_s23 = scalar_lea.vmem %s960_s5, 1024  ;;  %s825_s3 = smov [#allocation6]  }
  0x43   : > { %p720_p12 = scmp.ne.s32.totalorder %s960_s5, %s719_s23  ;;  %s724_s18 = sshll.u32 %s825_s3, 4  ;;  %s725_s18 = int_to_ptr.vmem [resolvable:$false] %s724_s18 }
  0x44   : > { %s726_s26 = scalar_lea.vmem %s725_s18, 2048  ;;  %p727_p5 = scmp.lt.s32.totalorder %s960_s5, %s725_s18 }
  0x45   : > { %p722_p10 = pnand %p720_p12, %p706_p3  ;;  %p728_p9 = scmp.lt.s32.totalorder %s726_s26, %s719_s23 }
  0x47   : > { %p723_p0 = pneg %p722_p10  ;;  %p729_p1 = por %p728_p9, %p727_p5 }
  0x49   : > { %p730_p2 = pnand %p729_p1, %p723_p0 }
  0x4b   : > { %733 = shalt.err (!%p730_p2)
}
  0x4c   : > { %603 = dma.hbm_to_vmem [thread:$0]  (!%p964_p13), %s958_s4, 1024, %s960_s5, %s968_s15, %s823_s6, %s823_s6, %s824_s7  }
  0x4d   : > { %p1086_p3 = scmp.ne.s32.totalorder %s1080_s21, 0 }
  0x4e   : > { %p1087_p7 = scmp.ne.s32.totalorder (!%p1086_p3), %s1076_s17, 0 }
  0x4f   : > { %181 = sbr.rel (%p1086_p3) target bundleno = 389 (0x185), region = 28 }
  0x56   : > { %787 = dma.done.wait (%p1087_p7), [#allocation4], 256  }
  0x57   : > { %789 = vsyncadd (%p1087_p7), [#allocation4], 4294967040  ;;  %s1006_s16 = sand.u32 1, %s804_s10   ;;  %p1088_p4 = scmp.ne.s32.totalorder %s1078_s19, 0 }
  0x58   : > { %s522_s8 = sshll.u32 %s1006_s16, 6  ;;  %s188_s27 = scalar_lea.sflag [#allocation7], %s1006_s16 }
  0x59   : > { %s191_s22 = scalar_lea.vmem [#allocation6], %s522_s8 }
  0x5a   : > { %791 = dma.done.wait (%p1088_p4), %s188_s27, 1024  }
  0x5b   : > { %793 = vsyncadd (%p1088_p4), %s188_s27, 4294966272  ;;  %v666_v0 = vld [vmem:[%s191_s22] sm:$0xff]   ;;  %v667_v1 = vld [vmem:[%s191_s22 + $0x8] sm:$0xff]   ;;  %s523_s17 = sshll.u32 %s1006_s16, 4  ;;  %s539_s6 = sshll.u32 %s812_s12, 6 }
  0x5c   : > { %568 = vmatprep.subr.bf16.mxu0 %v666_v0  ;;  %v668_v2 = vld [vmem:[%s191_s22 + $0x10] sm:$0xff]   ;;  %v669_v4 = vld [vmem:[%s191_s22 + $0x18] sm:$0xff]   ;;  %v670_v5 = vld [vmem:[%s191_s22 + $0x20] sm:$0xff]   ;;  %s211_s19 = scalar_lea.vmem [#allocation8], %s523_s17  ;;  %s1021_s5 = scalar_lea.hbm %s1071_s2, %s539_s6 }
  0x5d   : > { %569 = vmatpush3.bf16.xpose.msra.mxu0 %v666_v0  ;;  %v674_v3 = vld [vmem:[#allocation3] sm:$0xff]   ;;  %v671_v6 = vld [vmem:[%s191_s22 + $0x28] sm:$0xff]   ;;  %v673_v8 = vld [vmem:[%s191_s22 + $0x38] sm:$0xff]   ;;  %s408_s21 = sshll.u32 %s211_s19, 4  ;;  %s393_s15 = scalar_lea.sflag [#allocation5], %s1006_s16  ;;  %s1016_s21 = int_to_ptr.vmem [resolvable:$true] %s408_s21 }
  0x5e   : > { %570 = vmatprep.subr.bf16.mxu0 %v667_v1  ;;  %584 = vmatprep.mubr.bf16.mxu0 %v674_v3  ;;  %v672_v7 = vld [vmem:[%s191_s22 + $0x30] sm:$0xff]   ;;  %v675_v9 = vld [vmem:[#allocation3 + $0x8] sm:$0xff]   ;;  %s734_s29 = scalar_lea.vmem %s1016_s21, 256  ;;  %s826_s12 = smov [#allocation8]  }
  0x5f   : > { %p735_p13 = scmp.ne.s32.totalorder %s1016_s21, %s734_s29  ;;  %s738_s30 = sshll.u32 %s826_s12, 4  ;;  %s739_s30 = int_to_ptr.vmem [resolvable:$false] %s738_s30 }
  0x60   : > { %s740_s23 = scalar_lea.vmem %s739_s30, 512  ;;  %p741_p12 = scmp.lt.s32.totalorder %s1016_s21, %s739_s30 }
  0x61   : > { %p736_p6 = pnand %p735_p13, %p943_p11  ;;  %p742_p10 = scmp.lt.s32.totalorder %s740_s23, %s734_s29 }
  0x63   : > { %p737_p8 = pneg %p736_p6  ;;  %p743_p0 = por %p742_p10, %p741_p12 }
  0x65   : > { %571 = vmatpush3.bf16.xpose.msra.mxu0 %v667_v1  ;;  %p744_p5 = pnand %p743_p0, %p737_p8 }
  0x66   : > { %572 = vmatprep.subr.bf16.mxu0 %v668_v2 }
  0x6d   : > { %573 = vmatpush3.bf16.xpose.msra.mxu0 %v668_v2 }
  0x6e   : > { %574 = vmatprep.subr.bf16.mxu0 %v669_v4 }
  0x75   : > { %575 = vmatpush3.bf16.xpose.msra.mxu0 %v669_v4 }
  0x76   : > { %576 = vmatprep.subr.bf16.mxu0 %v670_v5 }
  0x7d   : > { %577 = vmatpush3.bf16.xpose.msra.mxu0 %v670_v5 }
  0x7e   : > { %578 = vmatprep.subr.bf16.mxu0 %v671_v6 }
  0x85   : > { %579 = vmatpush3.bf16.xpose.msra.mxu0 %v671_v6 }
  0x86   : > { %580 = vmatprep.subr.bf16.mxu0 %v672_v7 }
  0x8d   : > { %581 = vmatpush3.bf16.xpose.msra.mxu0 %v672_v7 }
  0x8e   : > { %582 = vmatprep.subr.bf16.mxu0 %v673_v8 }
  0x95   : > { %583 = vmatpush3.bf16.xpose.msra.mxu0 %v673_v8 }
  0x9c   : > { %585 = vmatmul.mubr.bf16.vlgmr.msra.gmra.mrb[0].mxu0 %v675_v9 }
 0x16f   : > { %v586_v10 = vpop.f32.mrb[0].mxu0 }
 0x170   : > { %v342_v11 = vpop.f32.mrb[1].mxu0 }
 0x171   : > { %v587_v12 = vpop.f32.mrb[2].mxu0 }
 0x172   : > { %v555_v13 = vpack.c.bf16 %v587_v12, %v586_v10  ;;  %v345_v14 = vpop.f32.mrb[3].mxu0 }
 0x173   : > { %v550_v15 = vpack.c.bf16 %v345_v14, %v342_v11 }
 0x174   : > { %557 = vst [vmem:[%s211_s19 + $0x8] sm:$0xff] %v555_v13  }
 0x175   : > { %551 = vst [vmem:[%s211_s19] sm:$0xff] %v550_v15  }
 0x176   : > { %747 = shalt.err (!%p744_p5)
}
 0x177   : > { %s748_s3 = scalar_lea.hbm %s1021_s5, 256  ;;  %s752_s8 = scalar_lea.hbm %s1071_s2, 768 }
 0x178   : > { %p749_p9 = scmp.ne.s32.totalorder %s1021_s5, %s748_s3  ;;  %p753_p3 = scmp.lt.u32.totalorder %s1021_s5, %s1071_s2 }
 0x179   : > { %p754_p7 = scmp.lt.u32.totalorder %s752_s8, %s748_s3  ;;  %p756_p13 = scmp.lt.u32.totalorder %s748_s3, %s1021_s5 }
 0x17a   : > { %p750_p1 = pnand %p749_p9, %p943_p11 }
 0x17b   : > { %p755_p4 = por %p754_p7, %p753_p3 }
 0x17c   : > { %p751_p2 = pneg %p750_p1 }
 0x17d   : > { %p757_p6 = por %p756_p13, %p755_p4 }
 0x17f   : > { %p758_p8 = pnand %p757_p6, %p751_p2 }
 0x181   : > { %761 = shalt.err (!%p758_p8)
}
 0x182   : > { %s827_s17 = smov 64   ;;  %s828_s19 = smov 192  }
 0x183   : > { %s829_s6 = smov 4  }
 0x184   : > { %594 = dma.vmem_to_hbm [thread:$0]  (%p943_p11), %s1016_s21, 256, %s1021_s5, %s393_s15, %s827_s17, %s828_s19, %s829_s6  }
 0x185 PF: > { %p611_p12 = scmp.ge.s32.totalorder %s820_s14, 2  ;;  %s423_s7 = sand.u32 1, %s800_s9  }
 0x186   : > { %p1089_p10 = scmp.ne.s32.totalorder %s1079_s20, 0  ;;  %s424_s4 = scalar_lea.sflag [#allocation5], %s423_s7 }
 0x188   : > { %p605_p0 = pnand %p611_p12, %p1089_p10 }
 0x18a   : > { %795 = dma.done.wait (!%p605_p0), %s424_s4, 256  }
 0x18b   : > { %797 = vsyncadd (!%p605_p0), %s424_s4, 4294967040  ;;  %s19_s14 = sadd.s32 1, %s820_s14   ;;  %s1090_s9 = smov %s804_s10 }
 0x18c   : > { %p16_p5 = scmp.ge.s32.totalorder %s19_s14, 5   ;;  %s1091_s10 = smov %s808_s11 }
 0x18d   : > { %s1092_s11 = smov %s952_s28  ;;  %s1093_s12 = smov %s816_s13 }
 0x18e   : > { %s1094_s13 = smov %s1096_s25  ;;  %18 = sbr.rel (!%p16_p5) target bundleno = 7 (0x7), region = 87 }
 0x195   :  { %429 = vsyncpa [#allocation4], 1 }
 0x196   :  { %431 = vsyncpa [#allocation4 + $0x1], 1 }
 0x197   :  { %432 = vsyncpa [#allocation7], 1 }
 0x198   :  { %434 = vsyncpa [#allocation7 + $0x1], 1 }
 0x199   :  { %435 = vsyncpa [#allocation5], 1 }
 0x19a   :  { %437 = vsyncpa [#allocation5 + $0x1], 1 }

</bundles_post_ra>
